<compile_context>
chip_gen: v6e
topology: v6e:2x2x1
jax: 0.10.0
libtpu: 0.0.40
codegen_flags: <defaults>
</compile_context>

<pallas_src>
import functools

import jax
import jax.numpy as jnp
from jax import lax
from jax.experimental import pallas as pl
from jax.experimental.pallas import tpu as pltpu

KERNEL_SIZE = 3
PAD = 1  # padding = 1 for kernel_size = 3


def _spatial_attention_kernel(w_ref, x_ref, o_ref, sum_ref, max_ref, pad_ref,
                              *, inv_c, W, HW, Nb):
    # w_ref   : SMEM (18,) f32     -- flattened conv weight (in-ch 0 = avg, 1 = max)
    # x_ref   : VMEM (Nb, Ct, HW)  -- channel tile of Nb batches, spatial on lanes
    # o_ref   : VMEM (Nb, HW)      -- lane-dense attention maps for this batch tile
    # sum_ref : VMEM (Nb, HW) f32  -- running channel sum
    # max_ref : VMEM (Nb, HW) f32  -- running channel max
    # pad_ref : VMEM (2*Nb, Lt) f32-- zero-padded (1-row halo) flattened avg/max maps
    k = pl.program_id(1)
    lo = W + 1  # start of the valid region inside the padded flattened maps

    @pl.when(k == 0)
    def _init():
        sum_ref[...] = jnp.zeros_like(sum_ref)
        max_ref[...] = jnp.full(max_ref.shape, -jnp.inf, jnp.float32)

    # Single load of this channel tile feeds both reductions (XLU sublane reduce).
    xb = x_ref[...].astype(jnp.float32)                          # (Nb, Ct, HW)
    sum_ref[...] += jnp.sum(xb, axis=1)
    max_ref[...] = jnp.maximum(max_ref[...], jnp.max(xb, axis=1))

    @pl.when(k == pl.num_programs(1) - 1)
    def _finalize():
        # Pooled maps, flattened, with a zero halo of one image row on each side.
        # Row (H-direction) out-of-bounds taps of the 3x3 conv land in the zero
        # halo; column (W-direction) out-of-bounds taps are masked below.
        pad_ref[...] = jnp.zeros_like(pad_ref)
        pad_ref[0:Nb, lo:lo + HW] = sum_ref[...] * inv_c         # avg maps
        pad_ref[Nb:2 * Nb, lo:lo + HW] = max_ref[...]            # max maps

        col = lax.broadcasted_iota(jnp.int32, (1, HW), 1) % W
        not_left = col >= 1              # tap dj = -1 stays inside the image row
        not_right = col <= (W - 2)       # tap dj = +1 stays inside the image row

        acc = jnp.zeros((Nb, HW), jnp.float32)
        t = 0
        for di in (-1, 0, 1):            # kernel row offset (kh = di + 1)
            for dj in (-1, 0, 1):        # kernel col offset (kw = dj + 1)
                start = lo + di * W + dj
                a_win = pad_ref[0:Nb, start:start + HW]
                m_win = pad_ref[Nb:2 * Nb, start:start + HW]
                tap = w_ref[t] * a_win + w_ref[9 + t] * m_win
                if dj == -1:
                    tap = jnp.where(not_left, tap, 0.0)
                elif dj == 1:
                    tap = jnp.where(not_right, tap, 0.0)
                acc = acc + tap
                t += 1

        o_ref[...] = jax.nn.sigmoid(acc).astype(o_ref.dtype)


def _pick_tiles(N, C, HW, itemsize, budget_bytes=8 << 20):
    """Pick (Nb, Ct): Ct divides C and obeys the (8,128) sublane rule (multiple
    of 8 or equal to C); Nb divides N (<= 8) so one input block stays within
    budget_bytes (double-buffered by the BlockSpec pipeline)."""
    if C * HW * itemsize <= budget_bytes:
        Ct = C
    else:
        Ct = None
        for ct in range(8, C, 8):
            if C % ct == 0 and ct * HW * itemsize <= budget_bytes:
                Ct = ct                      # keep the largest that fits
        if Ct is None:
            for ct in range(8, C, 8):
                if C % ct == 0:
                    Ct = ct
                    break
        if Ct is None:
            Ct = C
    Nb = 1
    for nb in range(1, min(N, 8) + 1):
        if N % nb == 0 and nb * Ct * HW * itemsize <= budget_bytes:
            Nb = nb
    return Nb, Ct


@jax.jit
def spatial_attention(x, weight):
    """x: (N, C, H, W) float; weight: (1, 2, 3, 3) float -> (N, 1, H, W)."""
    N, C, H, W = x.shape
    HW = H * W
    Lt = HW + 2 * (W + 1)   # flattened pooled map + one halo row on each side

    # Free, layout-preserving views: spatial goes on the (lane) minor axis.
    x2 = x.reshape(N, C, HW)
    w_flat = weight.reshape(-1).astype(jnp.float32)              # (18,)

    itemsize = x.dtype.itemsize
    Nb, Ct = _pick_tiles(N, C, HW, itemsize)
    n_bt = N // Nb
    n_ct = C // Ct

    in_block = Nb * Ct * HW * itemsize
    out_block = Nb * HW * itemsize
    scratch_bytes = (2 * Nb * HW + 2 * Nb * Lt) * 4
    need = 2 * (in_block + out_block) + scratch_bytes            # double-buffered
    vmem_limit = int(min(max(need + (8 << 20), 16 << 20), 48 << 20))

    kernel = functools.partial(
        _spatial_attention_kernel, inv_c=1.0 / C, W=W, HW=HW, Nb=Nb)

    out_flat = pl.pallas_call(
        kernel,
        out_shape=jax.ShapeDtypeStruct((N, HW), x.dtype),
        grid=(n_bt, n_ct),
        in_specs=[
            pl.BlockSpec(memory_space=pltpu.MemorySpace.SMEM),     # conv weights
            pl.BlockSpec((Nb, Ct, HW), lambda n, k: (n, k, 0)),    # x tile
        ],
        out_specs=pl.BlockSpec((Nb, HW), lambda n, k: (n, 0)),     # resident over k
        scratch_shapes=[
            pltpu.VMEM((Nb, HW), jnp.float32),     # running channel sum
            pltpu.VMEM((Nb, HW), jnp.float32),     # running channel max
            pltpu.VMEM((2 * Nb, Lt), jnp.float32),  # zero-padded avg/max maps
        ],
        compiler_params=pltpu.CompilerParams(
            dimension_semantics=("parallel", "arbitrary"),
            vmem_limit_bytes=vmem_limit),
    )(w_flat, x2)

    return out_flat.reshape(N, 1, H, W)


def _reference(x, weight):
    avg = jnp.mean(x, axis=1, keepdims=True)
    mx = jnp.max(x, axis=1, keepdims=True)
    cat = jnp.concatenate([avg, mx], axis=1)
    y = lax.conv_general_dilated(
        cat, weight, window_strides=(1, 1),
        padding=((PAD, PAD), (PAD, PAD)),
        dimension_numbers=("NCHW", "OIHW", "NCHW"))
    return jax.nn.sigmoid(y)


if __name__ == "__main__":
    key = jax.random.PRNGKey(0)
    kx, kw = jax.random.split(key)

    N, C, H, W = 2, 4, 16, 16
    x = jax.random.normal(kx, (N, C, H, W), dtype=jnp.float32)

    # Deterministic init matching nn.Conv2d default (kaiming_uniform a=sqrt(5)
    # => U(-1/sqrt(fan_in), 1/sqrt(fan_in)), fan_in = 2*3*3).
    fan_in = 2 * KERNEL_SIZE * KERNEL_SIZE
    bound = 1.0 / (fan_in ** 0.5)
    weight = jax.random.uniform(
        kw, (1, 2, KERNEL_SIZE, KERNEL_SIZE),
        minval=-bound, maxval=bound, dtype=jnp.float32)

    out = jax.block_until_ready(spatial_attention(x, weight))
    ref = jax.block_until_ready(_reference(x, weight))

    assert out.shape == (N, 1, H, W), out.shape
    if not jnp.allclose(out, ref, atol=1e-5, rtol=1e-5):
        raise AssertionError("Pallas kernel does not match reference")

    print("KERNEL_OK")
</pallas_src>

<mosaic_0001>
module attributes {stable_mosaic.version = 11 : i64} {
  func.func @_spatial_attention_kernel(%arg0: i32, %arg1: i32, %arg2: memref<18xf32, #tpu.memory_space<smem>>, %arg3: memref<2x4x256xf32, #tpu.memory_space<vmem>>, %arg4: memref<2x256xf32, #tpu.memory_space<vmem>>, %arg5: memref<2x256xf32, #tpu.memory_space<vmem>>, %arg6: memref<2x256xf32, #tpu.memory_space<vmem>>, %arg7: memref<4x290xf32, #tpu.memory_space<vmem>>) attributes {dimension_semantics = [#tpu.dimension_semantics<parallel>, #tpu.dimension_semantics<arbitrary>], iteration_bounds = array<i64: 1, 1>, scalar_prefetch = 0 : i64, scratch_operands = 3 : i64, tpu.core_type = #tpu.core_type<tc>, window_params = [{transform_indices = @transform_0, window_bounds = array<i64: 18>}, {transform_indices = @transform_1, window_bounds = array<i64: 2, 4, 256>}, {transform_indices = @transform_2, window_bounds = array<i64: 2, 256>}]} {
    %c0_i32 = arith.constant 0 : i32
    %0 = arith.cmpi eq, %arg1, %c0_i32 : i32
    %1 = arith.extui %0 : i1 to i32
    %c0_i32_0 = arith.constant 0 : i32
    %2 = arith.cmpi ne, %1, %c0_i32_0 : i32
    scf.if %2 {
      %cst_14 = arith.constant 0.000000e+00 : f32
      %15 = vector.broadcast %cst_14 : f32 to vector<2x256xf32>
      %c0_15 = arith.constant 0 : index
      %c0_16 = arith.constant 0 : index
      %16 = vector.load %arg5[%c0_15, %c0_16] : memref<2x256xf32, #tpu.memory_space<vmem>>, vector<2x256xf32>
      tpu.vector_store %arg5[%c0_15, %c0_16], %15 {strides = array<i32>} : memref<2x256xf32, #tpu.memory_space<vmem>>, vector<2x256xf32>,
      %cst_17 = arith.constant 0xFF800000 : f32
      %17 = vector.broadcast %cst_17 : f32 to vector<2x256xf32>
      %c0_18 = arith.constant 0 : index
      %c0_19 = arith.constant 0 : index
      %18 = vector.load %arg6[%c0_18, %c0_19] : memref<2x256xf32, #tpu.memory_space<vmem>>, vector<2x256xf32>
      tpu.vector_store %arg6[%c0_18, %c0_19], %17 {strides = array<i32>} : memref<2x256xf32, #tpu.memory_space<vmem>>, vector<2x256xf32>,
    } else {
    }
    %c0 = arith.constant 0 : index
    %c0_1 = arith.constant 0 : index
    %c0_2 = arith.constant 0 : index
    %3 = vector.load %arg3[%c0, %c0_1, %c0_2] : memref<2x4x256xf32, #tpu.memory_space<vmem>>, vector<2x4x256xf32>
    %c0_3 = arith.constant 0 : index
    %c0_4 = arith.constant 0 : index
    %4 = vector.load %arg5[%c0_3, %c0_4] : memref<2x256xf32, #tpu.memory_space<vmem>>, vector<2x256xf32>
    %cst = arith.constant dense<0.000000e+00> : vector<2x256xf32>
    %5 = vector.multi_reduction <add>, %3, %cst [1] : vector<2x4x256xf32> to vector<2x256xf32>
    %6 = arith.addf %4, %5 : vector<2x256xf32>
    %c0_5 = arith.constant 0 : index
    %c0_6 = arith.constant 0 : index
    %7 = vector.load %arg5[%c0_5, %c0_6] : memref<2x256xf32, #tpu.memory_space<vmem>>, vector<2x256xf32>
    tpu.vector_store %arg5[%c0_5, %c0_6], %6 {strides = array<i32>} : memref<2x256xf32, #tpu.memory_space<vmem>>, vector<2x256xf32>,
    %c0_7 = arith.constant 0 : index
    %c0_8 = arith.constant 0 : index
    %8 = vector.load %arg6[%c0_7, %c0_8] : memref<2x256xf32, #tpu.memory_space<vmem>>, vector<2x256xf32>
    %cst_9 = arith.constant dense<0xFF800000> : vector<2x256xf32>
    %9 = vector.multi_reduction <maximumf>, %3, %cst_9 [1] : vector<2x4x256xf32> to vector<2x256xf32>
    %10 = arith.maximumf %8, %9 : vector<2x256xf32>
    %c0_10 = arith.constant 0 : index
    %c0_11 = arith.constant 0 : index
    %11 = vector.load %arg6[%c0_10, %c0_11] : memref<2x256xf32, #tpu.memory_space<vmem>>, vector<2x256xf32>
    tpu.vector_store %arg6[%c0_10, %c0_11], %10 {strides = array<i32>} : memref<2x256xf32, #tpu.memory_space<vmem>>, vector<2x256xf32>,
    %c0_i32_12 = arith.constant 0 : i32
    %12 = arith.cmpi eq, %arg1, %c0_i32_12 : i32
    %13 = arith.extui %12 : i1 to i32
    %c0_i32_13 = arith.constant 0 : i32
    %14 = arith.cmpi ne, %13, %c0_i32_13 : i32
    scf.if %14 {
      %cst_14 = arith.constant 0.000000e+00 : f32
      %15 = vector.broadcast %cst_14 : f32 to vector<4x290xf32>
      %c0_15 = arith.constant 0 : index
      %c0_16 = arith.constant 0 : index
      %16 = vector.load %arg7[%c0_15, %c0_16] : memref<4x290xf32, #tpu.memory_space<vmem>>, vector<4x290xf32>
      tpu.vector_store %arg7[%c0_15, %c0_16], %15 {strides = array<i32>} : memref<4x290xf32, #tpu.memory_space<vmem>>, vector<4x290xf32>,
      %c0_17 = arith.constant 0 : index
      %c0_18 = arith.constant 0 : index
      %17 = vector.load %arg5[%c0_17, %c0_18] : memref<2x256xf32, #tpu.memory_space<vmem>>, vector<2x256xf32>
      %cst_19 = arith.constant 2.500000e-01 : f32
      %18 = vector.broadcast %cst_19 : f32 to vector<2x256xf32>
      %19 = arith.mulf %17, %18 : vector<2x256xf32>
      %c0_20 = arith.constant 0 : index
      %c17 = arith.constant 17 : index
      %20 = vector.load %arg7[%c0_20, %c17] : memref<4x290xf32, #tpu.memory_space<vmem>>, vector<2x256xf32>
      tpu.vector_store %arg7[%c0_20, %c17], %19 {strides = array<i32>} : memref<4x290xf32, #tpu.memory_space<vmem>>, vector<2x256xf32>,
      %c0_21 = arith.constant 0 : index
      %c0_22 = arith.constant 0 : index
      %21 = vector.load %arg6[%c0_21, %c0_22] : memref<2x256xf32, #tpu.memory_space<vmem>>, vector<2x256xf32>
      %c2 = arith.constant 2 : index
      %c17_23 = arith.constant 17 : index
      %22 = vector.load %arg7[%c2, %c17_23] : memref<4x290xf32, #tpu.memory_space<vmem>>, vector<2x256xf32>
      tpu.vector_store %arg7[%c2, %c17_23], %21 {strides = array<i32>} : memref<4x290xf32, #tpu.memory_space<vmem>>, vector<2x256xf32>,
      %23 = tpu.iota {dimensions = array<i32: 1>} : vector<1x256xi32>
      %c16_i32 = arith.constant 16 : i32
      %c0_i32_24 = arith.constant 0 : i32
      %24 = arith.cmpi eq, %c16_i32, %c0_i32_24 : i32
      %c1_i32 = arith.constant 1 : i32
      %25 = arith.select %24, %c1_i32, %c16_i32 : i32
      %26 = vector.broadcast %25 : i32 to vector<1x256xi32>
      %27 = arith.remsi %23, %26 : vector<1x256xi32>
      %c0_i32_25 = arith.constant 0 : i32
      %28 = vector.broadcast %c0_i32_25 : i32 to vector<1x256xi32>
      %29 = arith.cmpi ne, %27, %28 : vector<1x256xi32>
      %c0_i32_26 = arith.constant 0 : i32
      %30 = vector.broadcast %c0_i32_26 : i32 to vector<1x256xi32>
      %31 = arith.cmpi slt, %27, %30 : vector<1x256xi32>
      %c0_i32_27 = arith.constant 0 : i32
      %32 = arith.cmpi slt, %25, %c0_i32_27 : i32
      %33 = vector.broadcast %32 : i1 to vector<1x256xi1>
      %34 = vector.broadcast %33 : vector<1x256xi1> to vector<1x256xi1>
      %35 = arith.xori %31, %34 : vector<1x256xi1>
      %36 = arith.andi %35, %29 : vector<1x256xi1>
      %37 = vector.broadcast %25 : i32 to vector<1x256xi32>
      %38 = arith.addi %27, %37 : vector<1x256xi32>
      %39 = arith.select %36, %38, %27 : vector<1x256xi1>, vector<1x256xi32>
      %c1_i32_28 = arith.constant 1 : i32
      %40 = vector.broadcast %c1_i32_28 : i32 to vector<1x256xi32>
      %41 = arith.cmpi sge, %39, %40 : vector<1x256xi32>
      %c14_i32 = arith.constant 14 : i32
      %42 = vector.broadcast %c14_i32 : i32 to vector<1x256xi32>
      %43 = arith.cmpi sle, %39, %42 : vector<1x256xi32>
      %cst_29 = arith.constant 0.000000e+00 : f32
      %44 = vector.broadcast %cst_29 : f32 to vector<2x256xf32>
      %c0_30 = arith.constant 0 : index
      %c0_31 = arith.constant 0 : index
      %45 = vector.load %arg7[%c0_30, %c0_31] : memref<4x290xf32, #tpu.memory_space<vmem>>, vector<2x256xf32>
      %c2_32 = arith.constant 2 : index
      %c0_33 = arith.constant 0 : index
      %46 = vector.load %arg7[%c2_32, %c0_33] : memref<4x290xf32, #tpu.memory_space<vmem>>, vector<2x256xf32>
      %c0_34 = arith.constant 0 : index
      %47 = memref.load %arg2[%c0_34] : memref<18xf32, #tpu.memory_space<smem>>
      %48 = vector.broadcast %47 : f32 to vector<2x256xf32>
      %49 = arith.mulf %48, %45 : vector<2x256xf32>
      %c9 = arith.constant 9 : index
      %50 = memref.load %arg2[%c9] : memref<18xf32, #tpu.memory_space<smem>>
      %51 = vector.broadcast %50 : f32 to vector<2x256xf32>
      %52 = arith.mulf %51, %46 : vector<2x256xf32>
      %53 = arith.addf %49, %52 : vector<2x256xf32>
      %cst_35 = arith.constant 0.000000e+00 : f32
      %54 = vector.shape_cast %41 : vector<1x256xi1> to vector<1x256xi1>
      %55 = vector.broadcast %54 : vector<1x256xi1> to vector<2x256xi1>
      %56 = vector.broadcast %cst_35 : f32 to vector<2x256xf32>
      %57 = arith.select %55, %53, %56 : vector<2x256xi1>, vector<2x256xf32>
      %58 = arith.addf %44, %57 : vector<2x256xf32>
      %c0_36 = arith.constant 0 : index
      %c1 = arith.constant 1 : index
      %59 = vector.load %arg7[%c0_36, %c1] : memref<4x290xf32, #tpu.memory_space<vmem>>, vector<2x256xf32>
      %c2_37 = arith.constant 2 : index
      %c1_38 = arith.constant 1 : index
      %60 = vector.load %arg7[%c2_37, %c1_38] : memref<4x290xf32, #tpu.memory_space<vmem>>, vector<2x256xf32>
      %c1_39 = arith.constant 1 : index
      %61 = memref.load %arg2[%c1_39] : memref<18xf32, #tpu.memory_space<smem>>
      %62 = vector.broadcast %61 : f32 to vector<2x256xf32>
      %63 = arith.mulf %62, %59 : vector<2x256xf32>
      %c10 = arith.constant 10 : index
      %64 = memref.load %arg2[%c10] : memref<18xf32, #tpu.memory_space<smem>>
      %65 = vector.broadcast %64 : f32 to vector<2x256xf32>
      %66 = arith.mulf %65, %60 : vector<2x256xf32>
      %67 = arith.addf %63, %66 : vector<2x256xf32>
      %68 = arith.addf %58, %67 : vector<2x256xf32>
      %c0_40 = arith.constant 0 : index
      %c2_41 = arith.constant 2 : index
      %69 = vector.load %arg7[%c0_40, %c2_41] : memref<4x290xf32, #tpu.memory_space<vmem>>, vector<2x256xf32>
      %c2_42 = arith.constant 2 : index
      %c2_43 = arith.constant 2 : index
      %70 = vector.load %arg7[%c2_42, %c2_43] : memref<4x290xf32, #tpu.memory_space<vmem>>, vector<2x256xf32>
      %c2_44 = arith.constant 2 : index
      %71 = memref.load %arg2[%c2_44] : memref<18xf32, #tpu.memory_space<smem>>
      %72 = vector.broadcast %71 : f32 to vector<2x256xf32>
      %73 = arith.mulf %72, %69 : vector<2x256xf32>
      %c11 = arith.constant 11 : index
      %74 = memref.load %arg2[%c11] : memref<18xf32, #tpu.memory_space<smem>>
      %75 = vector.broadcast %74 : f32 to vector<2x256xf32>
      %76 = arith.mulf %75, %70 : vector<2x256xf32>
      %77 = arith.addf %73, %76 : vector<2x256xf32>
      %cst_45 = arith.constant 0.000000e+00 : f32
      %78 = vector.shape_cast %43 : vector<1x256xi1> to vector<1x256xi1>
      %79 = vector.broadcast %78 : vector<1x256xi1> to vector<2x256xi1>
      %80 = vector.broadcast %cst_45 : f32 to vector<2x256xf32>
      %81 = arith.select %79, %77, %80 : vector<2x256xi1>, vector<2x256xf32>
      %82 = arith.addf %68, %81 : vector<2x256xf32>
      %c0_46 = arith.constant 0 : index
      %c16 = arith.constant 16 : index
      %83 = vector.load %arg7[%c0_46, %c16] : memref<4x290xf32, #tpu.memory_space<vmem>>, vector<2x256xf32>
      %c2_47 = arith.constant 2 : index
      %c16_48 = arith.constant 16 : index
      %84 = vector.load %arg7[%c2_47, %c16_48] : memref<4x290xf32, #tpu.memory_space<vmem>>, vector<2x256xf32>
      %c3 = arith.constant 3 : index
      %85 = memref.load %arg2[%c3] : memref<18xf32, #tpu.memory_space<smem>>
      %86 = vector.broadcast %85 : f32 to vector<2x256xf32>
      %87 = arith.mulf %86, %83 : vector<2x256xf32>
      %c12 = arith.constant 12 : index
      %88 = memref.load %arg2[%c12] : memref<18xf32, #tpu.memory_space<smem>>
      %89 = vector.broadcast %88 : f32 to vector<2x256xf32>
      %90 = arith.mulf %89, %84 : vector<2x256xf32>
      %91 = arith.addf %87, %90 : vector<2x256xf32>
      %cst_49 = arith.constant 0.000000e+00 : f32
      %92 = vector.shape_cast %41 : vector<1x256xi1> to vector<1x256xi1>
      %93 = vector.broadcast %92 : vector<1x256xi1> to vector<2x256xi1>
      %94 = vector.broadcast %cst_49 : f32 to vector<2x256xf32>
      %95 = arith.select %93, %91, %94 : vector<2x256xi1>, vector<2x256xf32>
      %96 = arith.addf %82, %95 : vector<2x256xf32>
      %c0_50 = arith.constant 0 : index
      %c17_51 = arith.constant 17 : index
      %97 = vector.load %arg7[%c0_50, %c17_51] : memref<4x290xf32, #tpu.memory_space<vmem>>, vector<2x256xf32>
      %c2_52 = arith.constant 2 : index
      %c17_53 = arith.constant 17 : index
      %98 = vector.load %arg7[%c2_52, %c17_53] : memref<4x290xf32, #tpu.memory_space<vmem>>, vector<2x256xf32>
      %c4 = arith.constant 4 : index
      %99 = memref.load %arg2[%c4] : memref<18xf32, #tpu.memory_space<smem>>
      %100 = vector.broadcast %99 : f32 to vector<2x256xf32>
      %101 = arith.mulf %100, %97 : vector<2x256xf32>
      %c13 = arith.constant 13 : index
      %102 = memref.load %arg2[%c13] : memref<18xf32, #tpu.memory_space<smem>>
      %103 = vector.broadcast %102 : f32 to vector<2x256xf32>
      %104 = arith.mulf %103, %98 : vector<2x256xf32>
      %105 = arith.addf %101, %104 : vector<2x256xf32>
      %106 = arith.addf %96, %105 : vector<2x256xf32>
      %c0_54 = arith.constant 0 : index
      %c18 = arith.constant 18 : index
      %107 = vector.load %arg7[%c0_54, %c18] : memref<4x290xf32, #tpu.memory_space<vmem>>, vector<2x256xf32>
      %c2_55 = arith.constant 2 : index
      %c18_56 = arith.constant 18 : index
      %108 = vector.load %arg7[%c2_55, %c18_56] : memref<4x290xf32, #tpu.memory_space<vmem>>, vector<2x256xf32>
      %c5 = arith.constant 5 : index
      %109 = memref.load %arg2[%c5] : memref<18xf32, #tpu.memory_space<smem>>
      %110 = vector.broadcast %109 : f32 to vector<2x256xf32>
      %111 = arith.mulf %110, %107 : vector<2x256xf32>
      %c14 = arith.constant 14 : index
      %112 = memref.load %arg2[%c14] : memref<18xf32, #tpu.memory_space<smem>>
      %113 = vector.broadcast %112 : f32 to vector<2x256xf32>
      %114 = arith.mulf %113, %108 : vector<2x256xf32>
      %115 = arith.addf %111, %114 : vector<2x256xf32>
      %cst_57 = arith.constant 0.000000e+00 : f32
      %116 = vector.shape_cast %43 : vector<1x256xi1> to vector<1x256xi1>
      %117 = vector.broadcast %116 : vector<1x256xi1> to vector<2x256xi1>
      %118 = vector.broadcast %cst_57 : f32 to vector<2x256xf32>
      %119 = arith.select %117, %115, %118 : vector<2x256xi1>, vector<2x256xf32>
      %120 = arith.addf %106, %119 : vector<2x256xf32>
      %c0_58 = arith.constant 0 : index
      %c32 = arith.constant 32 : index
      %121 = vector.load %arg7[%c0_58, %c32] : memref<4x290xf32, #tpu.memory_space<vmem>>, vector<2x256xf32>
      %c2_59 = arith.constant 2 : index
      %c32_60 = arith.constant 32 : index
      %122 = vector.load %arg7[%c2_59, %c32_60] : memref<4x290xf32, #tpu.memory_space<vmem>>, vector<2x256xf32>
      %c6 = arith.constant 6 : index
      %123 = memref.load %arg2[%c6] : memref<18xf32, #tpu.memory_space<smem>>
      %124 = vector.broadcast %123 : f32 to vector<2x256xf32>
      %125 = arith.mulf %124, %121 : vector<2x256xf32>
      %c15 = arith.constant 15 : index
      %126 = memref.load %arg2[%c15] : memref<18xf32, #tpu.memory_space<smem>>
      %127 = vector.broadcast %126 : f32 to vector<2x256xf32>
      %128 = arith.mulf %127, %122 : vector<2x256xf32>
      %129 = arith.addf %125, %128 : vector<2x256xf32>
      %cst_61 = arith.constant 0.000000e+00 : f32
      %130 = vector.shape_cast %41 : vector<1x256xi1> to vector<1x256xi1>
      %131 = vector.broadcast %130 : vector<1x256xi1> to vector<2x256xi1>
      %132 = vector.broadcast %cst_61 : f32 to vector<2x256xf32>
      %133 = arith.select %131, %129, %132 : vector<2x256xi1>, vector<2x256xf32>
      %134 = arith.addf %120, %133 : vector<2x256xf32>
      %c0_62 = arith.constant 0 : index
      %c33 = arith.constant 33 : index
      %135 = vector.load %arg7[%c0_62, %c33] : memref<4x290xf32, #tpu.memory_space<vmem>>, vector<2x256xf32>
      %c2_63 = arith.constant 2 : index
      %c33_64 = arith.constant 33 : index
      %136 = vector.load %arg7[%c2_63, %c33_64] : memref<4x290xf32, #tpu.memory_space<vmem>>, vector<2x256xf32>
      %c7 = arith.constant 7 : index
      %137 = memref.load %arg2[%c7] : memref<18xf32, #tpu.memory_space<smem>>
      %138 = vector.broadcast %137 : f32 to vector<2x256xf32>
      %139 = arith.mulf %138, %135 : vector<2x256xf32>
      %c16_65 = arith.constant 16 : index
      %140 = memref.load %arg2[%c16_65] : memref<18xf32, #tpu.memory_space<smem>>
      %141 = vector.broadcast %140 : f32 to vector<2x256xf32>
      %142 = arith.mulf %141, %136 : vector<2x256xf32>
      %143 = arith.addf %139, %142 : vector<2x256xf32>
      %144 = arith.addf %134, %143 : vector<2x256xf32>
      %c0_66 = arith.constant 0 : index
      %c34 = arith.constant 34 : index
      %145 = vector.load %arg7[%c0_66, %c34] : memref<4x290xf32, #tpu.memory_space<vmem>>, vector<2x256xf32>
      %c2_67 = arith.constant 2 : index
      %c34_68 = arith.constant 34 : index
      %146 = vector.load %arg7[%c2_67, %c34_68] : memref<4x290xf32, #tpu.memory_space<vmem>>, vector<2x256xf32>
      %c8 = arith.constant 8 : index
      %147 = memref.load %arg2[%c8] : memref<18xf32, #tpu.memory_space<smem>>
      %148 = vector.broadcast %147 : f32 to vector<2x256xf32>
      %149 = arith.mulf %148, %145 : vector<2x256xf32>
      %c17_69 = arith.constant 17 : index
      %150 = memref.load %arg2[%c17_69] : memref<18xf32, #tpu.memory_space<smem>>
      %151 = vector.broadcast %150 : f32 to vector<2x256xf32>
      %152 = arith.mulf %151, %146 : vector<2x256xf32>
      %153 = arith.addf %149, %152 : vector<2x256xf32>
      %cst_70 = arith.constant 0.000000e+00 : f32
      %154 = vector.shape_cast %43 : vector<1x256xi1> to vector<1x256xi1>
      %155 = vector.broadcast %154 : vector<1x256xi1> to vector<2x256xi1>
      %156 = vector.broadcast %cst_70 : f32 to vector<2x256xf32>
      %157 = arith.select %155, %153, %156 : vector<2x256xi1>, vector<2x256xf32>
      %158 = arith.addf %144, %157 : vector<2x256xf32>
      %159 = arith.negf %158 : vector<2x256xf32>
      %160 = math.exp %159 : vector<2x256xf32>
      %cst_71 = arith.constant 1.000000e+00 : f32
      %161 = vector.broadcast %cst_71 : f32 to vector<2x256xf32>
      %162 = arith.addf %161, %160 : vector<2x256xf32>
      %163 = arith.divf %161, %162 : vector<2x256xf32>
      %c0_72 = arith.constant 0 : index
      %c0_73 = arith.constant 0 : index
      %164 = vector.load %arg4[%c0_72, %c0_73] : memref<2x256xf32, #tpu.memory_space<vmem>>, vector<2x256xf32>
      tpu.vector_store %arg4[%c0_72, %c0_73], %163 {strides = array<i32>} : memref<2x256xf32, #tpu.memory_space<vmem>>, vector<2x256xf32>,
    } else {
    }
    return
  }
  func.func @transform_0(%arg0: i32, %arg1: i32) -> i32 {
    %c0_i32 = arith.constant 0 : i32
    %c0_i32_0 = arith.constant 0 : i32
    return %c0_i32 : i32
  }
  func.func @transform_1(%arg0: i32, %arg1: i32) -> (i32, i32, i32) {
    %c0_i32 = arith.constant 0 : i32
    %c0_i32_0 = arith.constant 0 : i32
    return %arg0, %arg1, %c0_i32 : i32, i32, i32
  }
  func.func @transform_2(%arg0: i32, %arg1: i32) -> (i32, i32) {
    %c0_i32 = arith.constant 0 : i32
    %c0_i32_0 = arith.constant 0 : i32
    return %arg0, %c0_i32 : i32, i32
  }
}

</mosaic_0001>

<bundles_post_ra>
// kernel: spatial_attention.1
= control target key start
LH: loop header
LB: loop body
LE: loop exit
PB: predicated region body
PF: predicated region fallthrough
CT: control target
= control target key end

     0   :  { %7 = vsyncpa [#allocation6], 0  ;;  %s912_s0 = inlined_call_operand.vmem [shape: f32[18], index: 0, kind: input, shape index: {}]   ;;  %s913_s1 = inlined_call_operand.vmem [shape: f32[2,4,256], index: 1, kind: input, shape index: {}]   ;;  %s914_s2 = inlined_call_operand.vmem [shape: f32[2,256], index: 2, kind: output, shape index: {}]  }
   0x1   :  { %s14_s11 = sshll.u32 %s912_s0, 4  ;;  %s15_s11 = int_to_ptr.vmem [resolvable:$true] %s14_s11 }
   0x2   :  { %s677_s12 = scalar_lea.vmem %s15_s11, 16  ;;  %p682_p1 = scmp.lt.s32.totalorder %s15_s11, %s15_s11 }
   0x3   :  { %p678_p0 = scmp.ne.s32.totalorder %s15_s11, %s677_s12  ;;  %p683_p2 = scmp.lt.s32.totalorder %s677_s12, %s677_s12 }
   0x5   :  { %p684_p3 = por %p683_p2, %p682_p1 }
   0x7   :  { %p685_p4 = pnand %p684_p3, %p678_p0 }
   0x9   :  { %688 = shalt.err (!%p685_p4)
}
   0xa   :  { %s691_s13 = smov [#allocation5]  }
   0xb   :  { %17 = dma.vmem_to_smem %s15_s11, 16, %s691_s13, [#allocation6]  }
   0xc   :  { %689 = dma.done.wait [#allocation6], 16  }
   0xd   :  { %690 = vsyncadd [#allocation6], 4294967280 }
   0xe   :  { %23 = sfence }
   0xf   :  { %v30_v0 = vld [vmem:[%s913_s1] sm:$0xff]  ;;  %v31_v1 = vld [vmem:[%s913_s1 + $0x8] sm:$0xff]  ;;  %vm39_vm0 = vcmask 1043456   ;;  %v76_v2 = vlaneseq  ;;  %v692_v3 = vmov -inf   ;;  %v693_v12 = vmov 1983009808  }
  0x10   :  { %29 = vst [vmem:[#allocation3] sm:$0xf] %v692_v3  ;;  %v35_v4 = vcombine.high %v30_v0, %v30_v0  ;;  %v36_v5 = vcombine.high %v31_v1, %v31_v1  ;;  %v40_v6 = vsel %vm39_vm0, %v30_v0, 0.0  ;;  %v54_v7 = vsel %vm39_vm0, %v31_v1, 0.0  ;;  %s695_s0 = smov 17   ;;  %s739_s1 = sld [smem:[#allocation5 + $0xb]] }
  0x11   :  { %v41_v8 = vrot.slane %v40_v6, 4  ;;  %v55_v9 = vrot.slane %v54_v7, 4  ;;  %v74_v13 = vunpack.c.l.s4 %v693_v12  ;;  %v77_v18 = vshrl.u32 %v76_v2, 7  ;;  %s741_s18 = sld [smem:[#allocation5 + $0xa]]  ;;  %s696_s3 = smov 126  }
  0x12   :  { %v47_v10 = vsel %vm39_vm0, %v35_v4, 0.0  ;;  %v61_v11 = vsel %vm39_vm0, %v36_v5, 0.0  ;;  %v105_v19 = vsel %vm39_vm0, %v30_v0, -inf  ;;  %v112_v26 = vsel %vm39_vm0, %v35_v4, -inf  ;;  %s743_s19 = sld [smem:[#allocation5 + $0xd]]  ;;  %s697_s4 = smov 127  }
  0x13   :  { %v42_v14 = vadd.f32 %v41_v8, %v40_v6  ;;  %v48_v15 = vrot.slane %v47_v10, 4  ;;  %v56_v16 = vadd.f32 %v55_v9, %v54_v7  ;;  %v62_v17 = vrot.slane %v61_v11, 4  ;;  %s745_s20 = sld [smem:[#allocation5 + $0xc]]  ;;  %s698_s5 = smov 111  }
  0x14   :  { %v75_v24 = vunpack.c.0.s8 %v74_v13  ;;  %v106_v25 = vrot.slane %v105_v19, 4  ;;  %v119_v27 = vsel %vm39_vm0, %v31_v1, -inf  ;;  %v113_v33 = vrot.slane %v112_v26, 4  ;;  %s748_s21 = sld [smem:[#allocation5 + $0x2]]  ;;  %s699_s6 = smov 112  }
  0x15   :  { %v43_v20 = vrot.slane %v42_v14, 2  ;;  %v49_v21 = vadd.f32 %v48_v15, %v47_v10  ;;  %v57_v22 = vrot.slane %v56_v16, 2  ;;  %v63_v23 = vadd.f32 %v62_v17, %v61_v11  ;;  %s750_s22 = sld [smem:[#allocation5 + $0x1]]  ;;  %s700_s7 = smov 96  }
  0x16   :  { %v107_v32 = vmax.f32 %v105_v19, %v106_v25  ;;  %v120_v34 = vrot.slane %v119_v27, 4  ;;  %v126_v35 = vsel %vm39_vm0, %v36_v5, -inf  ;;  %v114_v41 = vmax.f32 %v112_v26, %v113_v33  ;;  %s752_s23 = sld [smem:[#allocation5 + $0x4]]  ;;  %s701_s8 = smov 110  }
  0x17   :  { %v44_v28 = vadd.f32 %v43_v20, %v42_v14  ;;  %v50_v29 = vrot.slane %v49_v21, 2  ;;  %v58_v30 = vadd.f32 %v57_v22, %v56_v16  ;;  %v64_v31 = vrot.slane %v63_v23, 2  ;;  %v104_v22 = vld [vmem:[#allocation3] sm:$0xf]  ;;  %s754_s24 = sld [smem:[#allocation5 + $0x3]]  ;;  %s702_s11 = smov 95  }
  0x18   :  { %v108_v40 = vrot.slane %v107_v32, 2  ;;  %v121_v42 = vmax.f32 %v119_v27, %v120_v34  ;;  %v127_v43 = vrot.slane %v126_v35, 4  ;;  %v115_v49 = vrot.slane %v114_v41, 2  ;;  %s757_s25 = sld [smem:[#allocation5 + $0xf]]  ;;  %s703_s12 = smov 94  }
  0x19   :  { %v45_v36 = vrot.slane %v44_v28, 1  ;;  %v51_v37 = vadd.f32 %v50_v29, %v49_v21  ;;  %v59_v38 = vrot.slane %v58_v30, 1  ;;  %v65_v39 = vadd.f32 %v64_v31, %v63_v23  ;;  %s761_s26 = sld [smem:[#allocation5 + $0xe]] }
  0x1a   :  { %v109_v48 = vmax.f32 %v107_v32, %v108_v40  ;;  %v122_v50 = vrot.slane %v121_v42, 2  ;;  %v128_v51 = vmax.f32 %v126_v35, %v127_v43  ;;  %vm167_vm1 = vcmask 273408   ;;  %s763_s27 = sld [smem:[#allocation5 + $0x6]] }
  0x1b   :  { %v46_v44 = vadd.f32 %v45_v36, %v44_v28  ;;  %v52_v45 = vrot.slane %v51_v37, 1  ;;  %v60_v46 = vadd.f32 %v59_v38, %v58_v30  ;;  %v66_v47 = vrot.slane %v65_v39, 1  ;;  %s765_s28 = sld [smem:[#allocation5 + $0x5]] }
  0x1c   :  { %v110_v54 = vrot.slane %v109_v48, 1  ;;  %v116_v55 = vmax.f32 %v114_v41, %v115_v49  ;;  %v123_v56 = vmax.f32 %v121_v42, %v122_v50  ;;  %v129_v57 = vrot.slane %v128_v51, 2  ;;  %s775_s29 = sld [smem:[#allocation5 + $0x10]] }
  0x1d   :  { %v53_v52 = vadd.f32 %v52_v45, %v51_v37  ;;  %v67_v53 = vadd.f32 %v66_v47, %v65_v39  ;;  %v694_v58 = vmov 0.0   ;;  %v78_v60 = vsub.s32 %v75_v24, %v77_v18  ;;  %s777_s30 = sld [smem:[#allocation5 + $0x7]] }
  0x1e   :  { %28 = vst [vmem:[#allocation2] sm:$0xf] %v694_v58  ;;  %166 = vst [vmem:[#allocation4] sm:$0xff] %v694_v58  ;;  %v111_v62 = vmax.f32 %v109_v48, %v110_v54  ;;  %v117_v63 = vrot.slane %v116_v55, 1  ;;  %v124_v0 = vrot.slane %v123_v56, 1  ;;  %v130_v1 = vmax.f32 %v128_v51, %v129_v57  ;;  %s817_s9 = sld [smem:[#allocation5 + $0x11]] }
  0x1f   :  { %168 = vst.msk [vmem:[#allocation4 + $0x8] sm:$0xf] %vm167_vm1, %v694_v58  ;;  %v72_v59 = vcombine.low %v46_v44, %v53_v52  ;;  %v80_v61 = vcombine.low %v60_v46, %v67_v53  ;;  %vm93_vm2 = vcmask 1041409   ;;  %vm95_vm3 = vcmask 1043459   ;;  %s823_s10 = sld [smem:[#allocation5 + $0x8]] }
  0x20   :  { %v118_v5 = vmax.f32 %v116_v55, %v117_v63  ;;  %v125_v6 = vmax.f32 %v123_v56, %v124_v0  ;;  %v131_v7 = vrot.slane %v130_v1, 1  ;;  %vm97_vm4 = vcmask 1045509   ;;  %s616_s13 = sld [smem:[#allocation5 + $0x9]] }
  0x21   :  { %v79_v3 = vrot.slane %v72_v59, %v78_v60  ;;  %v87_v4 = vrot.slane %v80_v61, %v78_v60  ;;  %vm99_vm5 = vcmask 1047559   ;;  %vm208_vm6 = vcmask 1043594   ;;  %s247_s14 = sld [smem:[#allocation5]] }
  0x22   :  { %v132_v9 = vmax.f32 %v130_v1, %v131_v7  ;;  %v137_v10 = vcombine.low %v111_v62, %v118_v5  ;;  %vm209_vm7 = vcmask 1047558   ;;  %vm182_vm8 = vcmask 138240  }
  0x23   :  { %v92_v8 = vrot.slane %v87_v4, 7  ;;  %vm212_vm9 = vcmask 134146   ;;  %vm210_vm10 = vmor %vm209_vm7, %vm208_vm6  ;;  %vm186_vm11 = vcmask 1041544   ;;  %vm187_vm12 = vcmask 1045508  }
  0x24   :  { %v145_v13 = vcombine.low %v125_v6, %v132_v9  ;;  %v144_v16 = vrot.slane %v137_v10, %v78_v60  ;;  %vm190_vm13 = vcmask 132096   ;;  %vm188_vm14 = vmor %vm187_vm12, %vm186_vm11  ;;  %v316_v38 = vstv %s739_s1 }
  0x25   :  { %v94_v11 = vsel %vm93_vm2, %v92_v8, %v79_v3  ;;  %v32_v14 = vld [vmem:[#allocation2] sm:$0xf]  ;;  %v278_v39 = vstv %s741_s18  ;;  %v400_v45 = vstv %s743_s19  ;;  %v360_v47 = vstv %s745_s20 }
  0x26   :  { %v96_v12 = vsel %vm95_vm3, %v92_v8, %v94_v11  ;;  %v152_v17 = vrot.slane %v145_v13, %v78_v60  ;;  %v312_v48 = vstv %s748_s21  ;;  %v274_v49 = vstv %s750_s22 }
  0x27   :  { %v98_v15 = vsel %vm97_vm4, %v92_v8, %v96_v12  ;;  %v396_v53 = vstv %s752_s23  ;;  %v356_v55 = vstv %s754_s24  ;;  %v478_v63 = vstv %s757_s25 }
  0x28   :  { %v100_v18 = vsel %vm99_vm5, %v92_v8, %v98_v15  ;;  %v155_v20 = vrot.slane %v152_v17, 7  ;;  %v438_v1 = vstv %s761_s26  ;;  %v474_v8 = vstv %s763_s27 }
  0x29   :  { %v102_v19 = vadd.f32 %v100_v18, %v32_v14  ;;  %v434_v10 = vstv %s765_s28  ;;  %vm342_vm15 = vcmask 1031168   ;;  %vm422_vm6 = vcmask 908288  }
  0x2a   :  { %v156_v21 = vsel %vm93_vm2, %v155_v20, %v144_v16  ;;  %v518_v16 = vstv %s775_s29  ;;  %vm300_vm2 = vcmask 1039360   ;;  %vm500_vm7 = vcmask 785408  }
  0x2b   :  { %103 = vst [vmem:[#allocation2] sm:$0xf] %v102_v19  ;;  %v157_v23 = vsel %vm95_vm3, %v155_v20, %v156_v21 }
  0x2c   :  { %v158_v24 = vsel %vm97_vm4, %v155_v20, %v157_v23  ;;  %v514_v23 = vstv %s777_s30 }
  0x2d   :  { %v159_v25 = vsel %vm99_vm5, %v155_v20, %v158_v24  ;;  %vm382_vm5 = vcmask 916480  }
  0x2e   :  { %v161_v26 = vmax.f32 %v104_v22, %v159_v25 }
  0x30   :  { %162 = vst [vmem:[#allocation3] sm:$0xf] %v161_v26 }
  0x32   :  { %v169_v27 = vld [vmem:[#allocation2] sm:$0xf] }
  0x33   :  { %v170_v29 = vmul.f32 0.25, %v169_v27 }
  0x35   :  { %v178_v31 = vrot.slane %v170_v29, %v78_v60 }
  0x37   :  { %v668_v28 = vld [vmem:[#allocation3] ss:$0 sps:$4 sm:$0xff]  }
  0x38   :  { %v201_v30 = vrot.slane %v668_v28, %v78_v60 }
  0x3a   :  { %202 = vrot.lane.b32.xlu0 %v201_v30, %s695_s0 }
  0x3e   :  { %179 = vrot.lane.b32.xlu0 %v178_v31, %s695_s0 }
  0xac   :  { %v203_v32 = vpop.permute.xlu0 %202 }
  0xad   :  { %v204_v33 = vrot.slane %v203_v32, 4 }
  0xaf   :  { %v205_v34 = vsel %vm182_vm8, %v204_v33, %v203_v32  ;;  %213 = vst.msk [vmem:[#allocation4 + $0x8] sm:$0xc] %vm212_vm9, %v204_v33  ;;  %vm578_vm9 = vcmask 769024  }
  0xb0   :  { %211 = vst.msk [vmem:[#allocation4] sm:$0xcc] %vm210_vm10, %v205_v34  ;;  %v180_v35 = vpop.permute.xlu0 %179  ;;  %vm540_vm10 = vcmask 777216  }
  0xb1   :  { %v181_v36 = vrot.slane %v180_v35, 4 }
  0xb3   :  { %v183_v37 = vsel %vm182_vm8, %v181_v36, %v180_v35  ;;  %191 = vst.msk [vmem:[#allocation4 + $0x8] sm:$0x3] %vm190_vm13, %v181_v36  ;;  %vm460_vm8 = vcmask 900096  }
  0xb4   :  { %189 = vst.msk [vmem:[#allocation4] sm:$0x33] %vm188_vm14, %v183_v37 }
  0xb6   :  { %v310_v40 = vld [vmem:[#allocation4 + $0x8] sm:$0xc] }
  0xb7   :  { %v272_v41 = vld [vmem:[#allocation4 + $0x8] sm:$0xc]  ;;  %v318_v42 = vmul.f32 %v316_v38, %v310_v40  ;;  %v271_v17 = vld [vmem:[#allocation4] sm:$0xcc] }
  0xb8   :  { %v280_v43 = vmul.f32 %v278_v39, %v272_v41  ;;  %v394_v44 = vld [vmem:[#allocation4 + $0x8] sm:$0xc]  ;;  %v279_v28 = vmul.f32 %v278_v39, %v271_v17  ;;  %v309_v29 = vld [vmem:[#allocation4] sm:$0xcc] }
  0xb9   :  { %v354_v46 = vld [vmem:[#allocation4 + $0x8] sm:$0xc]  ;;  %v402_v54 = vmul.f32 %v400_v45, %v394_v44  ;;  %v625_v58 = vrot.slane %v318_v42, 10  ;;  %v353_v30 = vld [vmem:[#allocation4] sm:$0xcc]  ;;  %v317_v37 = vmul.f32 %v316_v38, %v309_v29 }
  0xba   :  { %v308_v50 = vld [vmem:[#allocation4 + $0x8] sm:$0x3]  ;;  %v362_v56 = vmul.f32 %v360_v47, %v354_v46  ;;  %v621_v60 = vrot.slane %v280_v43, 10  ;;  %v472_v62 = vld [vmem:[#allocation4 + $0x8] sm:$0xc]  ;;  %v620_v40 = vrot.slane %v279_v28, 10  ;;  %v361_v41 = vmul.f32 %v360_v47, %v353_v30 }
  0xbb   :  { %v270_v51 = vld [vmem:[#allocation4 + $0x8] sm:$0x3]  ;;  %v314_v57 = vmul.f32 %v312_v48, %v308_v50  ;;  %v432_v0 = vld [vmem:[#allocation4 + $0x8] sm:$0xc]  ;;  %v633_v11 = vrot.slane %v402_v54, 10  ;;  %v480_v13 = vmul.f32 %v478_v63, %v472_v62 }
  0xbc   :  { %v392_v52 = vld [vmem:[#allocation4 + $0x8] sm:$0x3]  ;;  %v276_v59 = vmul.f32 %v274_v49, %v270_v51  ;;  %v629_v12 = vrot.slane %v362_v56, 10  ;;  %v440_v14 = vmul.f32 %v438_v1, %v432_v0  ;;  %v512_v15 = vld [vmem:[#allocation4 + $0x8] sm:$0xc]  ;;  %v628_v47 = vrot.slane %v361_v41, 10 }
  0xbd   :  { %v352_v61 = vld [vmem:[#allocation4 + $0x8] sm:$0x3]  ;;  %v328_v3 = vadd.f32 %v625_v58, %v314_v57  ;;  %v398_v5 = vmul.f32 %v396_v53, %v392_v52  ;;  %v269_v24 = vld [vmem:[#allocation4] sm:$0x33]  ;;  %v641_v25 = vrot.slane %v480_v13, 10  ;;  %v520_v27 = vmul.f32 %v518_v16, %v512_v15 }
  0xbe   :  { %v290_v4 = vadd.f32 %v621_v60, %v276_v59  ;;  %v358_v6 = vmul.f32 %v356_v55, %v352_v61  ;;  %v470_v7 = vld [vmem:[#allocation4 + $0x8] sm:$0x3]  ;;  %v637_v26 = vrot.slane %v440_v14, 10  ;;  %v275_v34 = vmul.f32 %v274_v49, %v269_v24  ;;  %v307_v35 = vld [vmem:[#allocation4] sm:$0x33] }
  0xbf   :  { %v430_v9 = vld [vmem:[#allocation4 + $0x8] sm:$0x3]  ;;  %340 = vrot.lane.b32.xlu1 %v328_v3, %s696_s3  ;;  %v412_v18 = vadd.f32 %v633_v11, %v398_v5  ;;  %v476_v20 = vmul.f32 %v474_v8, %v470_v7  ;;  %v351_v36 = vld [vmem:[#allocation4] sm:$0x33]  ;;  %v645_v39 = vrot.slane %v520_v27, 10  ;;  %v313_v44 = vmul.f32 %v312_v48, %v307_v35 }
  0xc0   :  { %298 = vrot.lane.b32.xlu0 %v290_v4, %s697_s4  ;;  %v372_v19 = vadd.f32 %v629_v12, %v358_v6  ;;  %v436_v21 = vmul.f32 %v434_v10, %v430_v9  ;;  %v510_v22 = vld [vmem:[#allocation4 + $0x8] sm:$0x3]  ;;  %v431_v42 = vld [vmem:[#allocation4] sm:$0xcc]  ;;  %v289_v38 = vadd.f32 %v620_v40, %v275_v34  ;;  %v357_v49 = vmul.f32 %v356_v55, %v351_v36  ;;  %v429_v50 = vld [vmem:[#allocation4] sm:$0x33] }
  0xc1   :  { %v490_v31 = vadd.f32 %v641_v25, %v476_v20  ;;  %v516_v33 = vmul.f32 %v514_v23, %v510_v22  ;;  %v393_v43 = vld [vmem:[#allocation4] sm:$0xcc]  ;;  %v391_v51 = vld [vmem:[#allocation4] sm:$0x33]  ;;  %v624_v52 = vrot.slane %v317_v37, 10  ;;  %v439_v48 = vmul.f32 %v438_v1, %v431_v42 }
  0xc2   :  { %v450_v32 = vadd.f32 %v637_v26, %v436_v21  ;;  %v401_v54 = vmul.f32 %v400_v45, %v393_v43  ;;  %v511_v56 = vld [vmem:[#allocation4] sm:$0xcc]  ;;  %v371_v57 = vadd.f32 %v628_v47, %v357_v49  ;;  %v435_v59 = vmul.f32 %v434_v10, %v429_v50  ;;  %v509_v61 = vld [vmem:[#allocation4] sm:$0x33]  ;;  %v548_v26 = vld [vmem:[#allocation4 + $0x8] sm:$0x3] }
  0xc3   :  { %420 = vrot.lane.b32.xlu1 %v412_v18, %s698_s5  ;;  %v530_v46 = vadd.f32 %v645_v39, %v516_v33  ;;  %v471_v55 = vld [vmem:[#allocation4] sm:$0xcc]  ;;  %v327_v58 = vadd.f32 %v624_v52, %v313_v44  ;;  %v397_v60 = vmul.f32 %v396_v53, %v391_v51  ;;  %v469_v62 = vld [vmem:[#allocation4] sm:$0x33]  ;;  %v636_v0 = vrot.slane %v439_v48, 10 }
  0xc4   :  { %380 = vrot.lane.b32.xlu0 %v372_v19, %s699_s6  ;;  %v632_v1 = vrot.slane %v401_v54, 10  ;;  %v519_v45 = vmul.f32 %v518_v16, %v511_v56  ;;  %v479_v3 = vmul.f32 %v478_v63, %v471_v55  ;;  %v549_v4 = vld [vmem:[#allocation4] sm:$0xcc]  ;;  %v556_v5 = vstv %s817_s9  ;;  %v547_v53 = vld [vmem:[#allocation4] sm:$0x33] }
  0xc5   :  { %v449_v6 = vadd.f32 %v636_v0, %v435_v59  ;;  %v515_v9 = vmul.f32 %v514_v23, %v509_v61  ;;  %v475_v10 = vmul.f32 %v474_v8, %v469_v62  ;;  %v552_v11 = vstv %s823_s10  ;;  %v550_v23 = vld [vmem:[#allocation4 + $0x8] sm:$0xc]  ;;  %v246_v43 = vld [vmem:[#allocation4] sm:$0xcc]  ;;  %v245_v49 = vld [vmem:[#allocation4] sm:$0x33] }
  0xc6   :  { %v411_v7 = vadd.f32 %v632_v1, %v397_v60  ;;  %v644_v12 = vrot.slane %v519_v45, 10  ;;  %v640_v13 = vrot.slane %v479_v3, 10  ;;  %v557_v14 = vmul.f32 %v556_v5, %v549_v4 }
  0xc7   :  { %498 = vrot.lane.b32.xlu1 %v490_v31, %s700_s7  ;;  %v553_v17 = vmul.f32 %v552_v11, %v547_v53  ;;  %v335_v18 = vcombine.high %v327_v58, %v327_v58  ;;  %v293_v20 = vcombine.high %v289_v38, %v289_v38  ;;  %v375_v22 = vcombine.high %v371_v57, %v371_v57 }
  0xc8   :  { %458 = vrot.lane.b32.xlu0 %v450_v32, %s701_s8  ;;  %v529_v15 = vadd.f32 %v644_v12, %v515_v9  ;;  %v489_v16 = vadd.f32 %v640_v13, %v475_v10  ;;  %v648_v63 = vrot.slane %v557_v14, 10  ;;  %v415_v8 = vcombine.high %v411_v7, %v411_v7 }
  0xc9   :  { %v453_v25 = vcombine.high %v449_v6, %v449_v6  ;;  %v558_v27 = vmul.f32 %v556_v5, %v550_v23  ;;  %v554_v29 = vmul.f32 %v552_v11, %v548_v26  ;;  %v251_v44 = vstv %s616_s13 }
  0xca   :  { %v567_v19 = vadd.f32 %v648_v63, %v553_v17  ;;  %v493_v21 = vcombine.high %v489_v16, %v489_v16  ;;  %v533_v28 = vcombine.high %v529_v15, %v529_v15  ;;  %v252_v50 = vmul.f32 %v251_v44, %v246_v43 }
  0xcb   :  { %294 = vrot.lane.b32.xlu1 %v289_v38, %s697_s4  ;;  %v649_v30 = vrot.slane %v558_v27, 10  ;;  %v248_v38 = vstv %s247_s14 }
  0xcc   :  { %538 = vrot.lane.b32.xlu0 %v530_v46, %s702_s11  ;;  %v571_v24 = vcombine.high %v567_v19, %v567_v19  ;;  %v215_v46 = vand.u32 127, %v76_v2  ;;  %v249_v52 = vmul.f32 %v248_v38, %v245_v49  ;;  %v617_v54 = vrot.slane %v252_v50, 10 }
  0xcd   :  { %v568_v31 = vadd.f32 %v649_v30, %v554_v29 }
  0xce   :  { %v216_v48 = vadd.s32 128, %v215_v46 }
  0xcf   :  { %336 = vrot.lane.b32.xlu1 %v327_v58, %s696_s3  ;;  %v221_v58 = vand.u32 15, %v215_v46 }
  0xd0   :  { %376 = vrot.lane.b32.xlu0 %v371_v57, %s699_s6  ;;  %v257_v57 = vadd.f32 %v617_v54, %v249_v52  ;;  %v228_v59 = vand.u32 15, %v216_v48 }
  0xd1   :  { %vm863_vm0 = vcmp.ge.s32.totalorder %v221_v58, 1  ;;  %vm871_vm3 = vcmp.le.s32.totalorder %v221_v58, 14 }
  0xd2   :  { %v263_v62 = vcombine.high %v257_v57, %v257_v57  ;;  %vm867_vm1 = vcmp.ge.s32.totalorder %v228_v59, 1  ;;  %vm875_vm4 = vcmp.le.s32.totalorder %v228_v59, 14 }
  0xd3   :  { %416 = vrot.lane.b32.xlu1 %v411_v7, %s698_s5  ;;  %v265_v7 = vsel %vm863_vm0, %v257_v57, 0.0 }
  0xd4   :  { %454 = vrot.lane.b32.xlu0 %v449_v6, %s701_s8  ;;  %v266_v9 = vsel %vm867_vm1, %v263_v62, 0.0 }
  0xd7   :  { %494 = vrot.lane.b32.xlu1 %v489_v16, %s700_s7 }
  0xd8   :  { %534 = vrot.lane.b32.xlu0 %v529_v15, %s702_s11 }
  0xdb   :  { %572 = vrot.lane.b32.xlu1 %v567_v19, %s703_s12 }
  0xdc   :  { %338 = vrot.lane.b32.xlu0 %v335_v18, %s696_s3 }
  0xdf   :  { %296 = vrot.lane.b32.xlu1 %v293_v20, %s697_s4 }
  0xe0   :  { %418 = vrot.lane.b32.xlu0 %v415_v8, %s698_s5 }
  0xe3   :  { %378 = vrot.lane.b32.xlu1 %v375_v22, %s699_s6 }
  0xe4   :  { %496 = vrot.lane.b32.xlu0 %v493_v21, %s700_s7 }
  0xe7   :  { %456 = vrot.lane.b32.xlu1 %v453_v25, %s701_s8 }
  0xe8   :  { %574 = vrot.lane.b32.xlu0 %v571_v24, %s703_s12 }
  0xeb   :  { %536 = vrot.lane.b32.xlu1 %v533_v28, %s702_s11 }
  0xef   :  { %576 = vrot.lane.b32.xlu1 %v568_v31, %s703_s12 }
 0x131   :  { %v341_v32 = vpop.permute.xlu1 %340 }
 0x132   :  { %v299_v33 = vpop.permute.xlu0 %298 }
 0x135   :  { %v854_v34 = vpop.permute.xlu1 %420 }
 0x136   :  { %v381_v35 = vpop.permute.xlu0 %380 }
 0x139   :  { %v856_v36 = vpop.permute.xlu1 %498 }
 0x13a   :  { %v858_v37 = vpop.permute.xlu0 %458 }
 0x13d   :  { %v295_v40 = vpop.permute.xlu1 %294 }
 0x13e   :  { %v860_v39 = vpop.permute.xlu0 %538 }
 0x141   :  { %v337_v42 = vpop.permute.xlu1 %336 }
 0x142   :  { %v377_v41 = vpop.permute.xlu0 %376 }
 0x145   :  { %v417_v47 = vpop.permute.xlu1 %416 }
 0x146   :  { %v455_v51 = vpop.permute.xlu0 %454 }
 0x149   :  { %v495_v55 = vpop.permute.xlu1 %494 }
 0x14a   :  { %v535_v56 = vpop.permute.xlu0 %534 }
 0x14d   :  { %v573_v61 = vpop.permute.xlu1 %572 }
 0x14e   :  { %v339_v60 = vpop.permute.xlu0 %338 }
 0x14f   :  { %v343_v3 = vsel %vm342_vm15, %v337_v42, %v339_v60  ;;  %v344_v4 = vsel %vm342_vm15, %v339_v60, %v341_v32 }
 0x150   :  { %v347_v13 = vsel %vm871_vm3, %v343_v3, 0.0  ;;  %v348_v14 = vsel %vm875_vm4, %v344_v4, 0.0 }
 0x151   :  { %v297_v6 = vpop.permute.xlu1 %296 }
 0x152   :  { %v419_v5 = vpop.permute.xlu0 %418  ;;  %v301_v10 = vsel %vm300_vm2, %v295_v40, %v297_v6  ;;  %v302_v53 = vsel %vm300_vm2, %v297_v6, %v299_v33 }
 0x153   :  { %v305_v11 = vadd.f32 %v301_v10, %v265_v7  ;;  %v306_v12 = vadd.f32 %v302_v53, %v266_v9  ;;  %v423_v23 = vsel %vm422_vm6, %v417_v47, %v419_v5  ;;  %v424_v24 = vsel %vm422_vm6, %v419_v5, %v854_v34 }
 0x155   :  { %v349_v15 = vadd.f32 %v347_v13, %v305_v11  ;;  %v350_v16 = vadd.f32 %v348_v14, %v306_v12  ;;  %v379_v63 = vpop.permute.xlu1 %378 }
 0x156   :  { %v497_v17 = vpop.permute.xlu0 %496  ;;  %v383_v18 = vsel %vm382_vm5, %v377_v41, %v379_v63  ;;  %v384_v19 = vsel %vm382_vm5, %v379_v63, %v381_v35 }
 0x157   :  { %v387_v8 = vsel %vm863_vm0, %v383_v18, 0.0  ;;  %v388_v20 = vsel %vm867_vm1, %v384_v19, 0.0  ;;  %v501_v26 = vsel %vm500_vm7, %v495_v55, %v497_v17  ;;  %v502_v30 = vsel %vm500_vm7, %v497_v17, %v856_v36 }
 0x158   :  { %v389_v21 = vadd.f32 %v387_v8, %v349_v15  ;;  %v390_v22 = vadd.f32 %v388_v20, %v350_v16  ;;  %v505_v34 = vsel %vm863_vm0, %v501_v26, 0.0  ;;  %v506_v43 = vsel %vm867_vm1, %v502_v30, 0.0 }
 0x159   :  { %v457_v25 = vpop.permute.xlu1 %456 }
 0x15a   :  { %v427_v27 = vadd.f32 %v423_v23, %v389_v21  ;;  %v428_v28 = vadd.f32 %v424_v24, %v390_v22  ;;  %v461_v29 = vsel %vm460_vm8, %v455_v51, %v457_v25  ;;  %v575_v31 = vpop.permute.xlu0 %574  ;;  %v462_v32 = vsel %vm460_vm8, %v457_v25, %v858_v37 }
 0x15b   :  { %v465_v33 = vsel %vm871_vm3, %v461_v29, 0.0  ;;  %v466_v35 = vsel %vm875_vm4, %v462_v32, 0.0  ;;  %v579_v36 = vsel %vm578_vm9, %v573_v61, %v575_v31 }
 0x15c   :  { %v467_v40 = vadd.f32 %v465_v33, %v427_v27  ;;  %v468_v41 = vadd.f32 %v466_v35, %v428_v28  ;;  %v583_v50 = vsel %vm871_vm3, %v579_v36, 0.0 }
 0x15d   :  { %v537_v42 = vpop.permute.xlu1 %536 }
 0x15e   :  { %v507_v44 = vadd.f32 %v505_v34, %v467_v40  ;;  %v541_v37 = vsel %vm540_vm10, %v535_v56, %v537_v42  ;;  %v508_v46 = vadd.f32 %v506_v43, %v468_v41  ;;  %v542_v38 = vsel %vm540_vm10, %v537_v42, %v860_v39 }
 0x160   :  { %v545_v49 = vadd.f32 %v541_v37, %v507_v44  ;;  %v546_v47 = vadd.f32 %v542_v38, %v508_v46 }
 0x161   :  { %v577_v51 = vpop.permute.xlu1 %576 }
 0x162   :  { %v585_v52 = vadd.f32 %v583_v50, %v545_v49  ;;  %v580_v48 = vsel %vm578_vm9, %v575_v31, %v577_v51 }
 0x163   :  { %v584_v54 = vsel %vm875_vm4, %v580_v48, 0.0 }
 0x164   :  { %v650_v55 = vmul.f32 -1.442695, %v585_v52  ;;  %v586_v57 = vadd.f32 %v584_v54, %v546_v47 }
 0x166   :  { %669 = vpow2.f32 %v650_v55  ;;  %v651_v58 = vmul.f32 -1.442695, %v586_v57 }
 0x168   :  { %671 = vpow2.f32 %v651_v58 }
 0x173   :  { %v670_v56 = vpop.eup %669 }
 0x174   :  { %v593_v59 = vadd.f32 1.0, %v670_v56 }
 0x175   :  { %v672_v39 = vpop.eup %671 }
 0x176   :  { %v594_v60 = vadd.f32 1.0, %v672_v39  ;;  %673 = vrcp.f32 %v593_v59 }
 0x178   :  { %675 = vrcp.f32 %v594_v60 }
 0x183   :  { %v674_v61 = vpop.eup %673 }
 0x185   :  { %v676_v62 = vpop.eup %675 }
 0x186   :  { %v601_v0 = vcombine.low %v674_v61, %v676_v62 }
 0x188   :  { %652 = vst.sshfl [vmem:[%s914_s2] sm:$0x33 pattern:$0x76325410] %v601_v0 }
 0x189   :  { %615 = vsyncpa [#allocation6], 1 }

</bundles_post_ra>
